<compile_context>
chip_gen: v7x
topology: tpu7x:2x2x1
jax: 0.10.0
libtpu: 0.0.40
codegen_flags: <defaults>
</compile_context>

<pallas_src>
import functools

import jax
import jax.numpy as jnp
import numpy as np
from jax.experimental import pallas as pl
from jax.experimental.pallas import tpu as pltpu

_LANE = 128


def _prop_kernel(adj_ref, sblk_ref, scur_ref,
                 w_agg_ref, w_x_ref, w_xh_ref, bias_ref,
                 out_ref, *, slot):
    # adj:  (Bb, N, 2*NE)        = [A_in | A_out]
    # sblk: (Bb, 2*NE, 2*D)      = blockdiag(state_in, state_out)
    # scur: (Bb, N, D)
    # w_agg: (2D, 3*slot)  w_x: (D, 2*slot)  w_xh: (D, D)  bias: (1, 3*slot)
    adj = adj_ref[...]
    s_blk = sblk_ref[...]
    x3 = scur_ref[...]
    bb, n, d = x3.shape
    m = bb * n

    # One fused per-sample aggregation: result columns are [a_in | a_out].
    a_comb = jnp.einsum('bnk,bkd->bnd', adj, s_blk,
                        preferred_element_type=jnp.float32)          # (Bb,N,2D)

    # Fold the batch block into the matmul M dimension (weights are shared).
    a_f = a_comb.reshape(m, 2 * d).astype(w_agg_ref.dtype)
    x = x3.reshape(m, d)
    x32 = x.astype(jnp.float32)

    # Fused, 128-lane-slot-aligned gate pre-activations: slots are [z | r | h].
    pre = (jnp.dot(a_f, w_agg_ref[...], preferred_element_type=jnp.float32)
           + bias_ref[...])                                          # (M,3*slot)
    pre_x = jnp.dot(x.astype(w_x_ref.dtype), w_x_ref[...],
                    preferred_element_type=jnp.float32)              # (M,2*slot)

    # Every slice below starts at a multiple of 128 lanes -> no lane rotation.
    z = jax.nn.sigmoid(pre[:, 0:d] + pre_x[:, 0:d])
    r = jax.nn.sigmoid(pre[:, slot:slot + d] + pre_x[:, slot:slot + d])
    h_hat = jnp.tanh(pre[:, 2 * slot:2 * slot + d]
                     + jnp.dot((r * x32).astype(w_xh_ref.dtype), w_xh_ref[...],
                               preferred_element_type=jnp.float32))

    out = (1.0 - z) * x32 + z * h_hat
    out_ref[...] = out.reshape(bb, n, d).astype(out_ref.dtype)


def _padded_tile_bytes(rows, cols, itemsize):
    """VMEM bytes of a 2D block after sublane/lane padding."""
    sub = 8 * max(1, 4 // itemsize)          # 8 for f32, 16 for bf16
    rows_p = -(-rows // sub) * sub
    cols_p = -(-cols // _LANE) * _LANE
    return rows_p * cols_p * itemsize


def _vmem_capacity_bytes():
    try:
        info = pltpu.get_tpu_info()
        for attr in ("vmem_capacity_bytes", "vmem_bytes", "vmem_size_bytes"):
            v = getattr(info, attr, None)
            if v:
                return int(v)
    except Exception:
        pass
    return 64 << 20   # conservative default (v7x per-TensorCore VMEM)


def _pick_batch_block(batch, n_rows, per_sample_bytes, vmem_budget_bytes,
                      target_rows=1024, max_rows=2048, min_grid_steps=2):
    """Batch-block size: ~target_rows MXU rows, VMEM-budgeted, grid >= 2."""
    cap_rows = max(1, max_rows // max(1, n_rows))
    cap_vmem = max(1, vmem_budget_bytes // max(1, 2 * per_sample_bytes))
    want = max(1, target_rows // max(1, n_rows))
    bb = min(want, cap_rows, cap_vmem, batch)
    if batch >= min_grid_steps:
        # Keep >= min_grid_steps grid steps so ("parallel",) can shard across
        # v7x's two TensorCores (grid=(1,) idles a core).
        bb = min(bb, -(-batch // min_grid_steps))
    return max(1, bb)


def prop_model_pallas(state_in, state_out, state_cur, adj_matrix,
                      wz, bz, wr, br, wh, bh, *,
                      compute_dtype=jnp.float32,
                      target_rows=1024, max_rows=2048):
    """GGNN propagation step. Weights are stored transposed ([3D, D]) so
    y = a @ w + b matches the PyTorch Linear."""
    B, N, D = state_cur.shape
    NE = state_in.shape[1]
    assert adj_matrix.shape == (B, N, 2 * NE)
    out_dtype = state_cur.dtype

    slot = -(-D // _LANE) * _LANE    # 128-lane-aligned gate column slot

    # --- block-diagonal state: one adjacency matmul gives [a_in | a_out] ----
    zin = jnp.zeros_like(state_in)
    zout = jnp.zeros_like(state_out)
    s_blk = jnp.concatenate(
        [jnp.concatenate([state_in, zin], axis=2),
         jnp.concatenate([zout, state_out], axis=2)], axis=1)   # (B, 2NE, 2D)

    # --- pack gate weights / bias into 128-aligned [z | r | h] slots --------
    def pack(mats, width):
        cols = [jnp.pad(m_, ((0, 0), (0, width - m_.shape[1])))
                if m_.shape[1] != width else m_ for m_ in mats]
        return jnp.concatenate(cols, axis=1)

    w_agg = pack([wz[:2 * D], wr[:2 * D], wh[:2 * D]], slot)    # (2D, 3*slot)
    w_x = pack([wz[2 * D:], wr[2 * D:]], slot)                  # (D, 2*slot)
    w_xh = wh[2 * D:]                                           # (D, D)
    bias = pack([bz, br, bh], slot).astype(jnp.float32)         # (1, 3*slot)

    # --- dtype of streamed operands / weights (bf16 recommended v6e/v7x) ----
    cd = compute_dtype
    adj = adj_matrix.astype(cd)
    s_blk = s_blk.astype(cd)
    s_cur = state_cur.astype(cd)
    w_agg = w_agg.astype(cd)
    w_x = w_x.astype(cd)
    w_xh = w_xh.astype(cd)

    # --- batch-block sizing against a real (lane-padded) VMEM budget --------
    isz = np.dtype(cd).itemsize
    osz = np.dtype(out_dtype).itemsize
    per_sample = (_padded_tile_bytes(N, 2 * NE, isz)        # adjacency
                  + _padded_tile_bytes(2 * NE, 2 * D, isz)  # block-diag state
                  + _padded_tile_bytes(N, D, isz)           # state_cur
                  + _padded_tile_bytes(N, D, osz))          # output
    weight_bytes = (_padded_tile_bytes(2 * D, 3 * slot, isz)
                    + _padded_tile_bytes(D, 2 * slot, isz)
                    + _padded_tile_bytes(D, D, isz)
                    + _padded_tile_bytes(1, 3 * slot, 4))

    vmem_cap = _vmem_capacity_bytes()
    budget = int(vmem_cap * 0.4) - 2 * weight_bytes   # headroom for scratch
    bb = _pick_batch_block(B, N, per_sample, budget,
                           target_rows=target_rows, max_rows=max_rows)

    needed = 2 * (bb * per_sample + weight_bytes) + (4 << 20)
    vmem_limit = int(min(vmem_cap * 3 // 4, max(needed, 32 << 20)))

    # --- pad batch so every grid step gets a full block ---------------------
    n_steps = -(-B // bb)
    B_pad = n_steps * bb
    if B_pad != B:
        pad = ((0, B_pad - B), (0, 0), (0, 0))
        adj = jnp.pad(adj, pad)
        s_blk = jnp.pad(s_blk, pad)
        s_cur = jnp.pad(s_cur, pad)

    batch_spec = lambda r, c: pl.BlockSpec((bb, r, c), lambda i: (i, 0, 0))
    const_spec = lambda r, c: pl.BlockSpec((r, c), lambda i: (0, 0))

    out = pl.pallas_call(
        functools.partial(_prop_kernel, slot=slot),
        out_shape=jax.ShapeDtypeStruct((B_pad, N, D), out_dtype),
        grid=(n_steps,),
        in_specs=[
            batch_spec(N, 2 * NE),        # adjacency [A_in | A_out]
            batch_spec(2 * NE, 2 * D),    # blockdiag(state_in, state_out)
            batch_spec(N, D),             # state_cur
            const_spec(2 * D, 3 * slot),  # packed [Wz|Wr|Wh] for [a_in|a_out]
            const_spec(D, 2 * slot),      # packed [Wz|Wr] for s_cur
            const_spec(D, D),             # Wh block for r*s_cur
            const_spec(1, 3 * slot),      # packed bias [bz|br|bh]
        ],
        out_specs=batch_spec(N, D),
        compiler_params=pltpu.CompilerParams(
            dimension_semantics=("parallel",),
            vmem_limit_bytes=vmem_limit),
    )(adj, s_blk, s_cur, w_agg, w_x, w_xh, bias)

    return out[:B] if B_pad != B else out


def prop_model_ref(state_in, state_out, state_cur, adj_matrix,
                   wz, bz, wr, br, wh, bh, n_nodes, n_edge_types):
    """Pure-JAX reference mirroring the PyTorch forward."""
    ne = n_nodes * n_edge_types
    A_in = adj_matrix[:, :, :ne]
    A_out = adj_matrix[:, :, ne:]
    a_in = jnp.einsum('bnk,bkd->bnd', A_in, state_in)
    a_out = jnp.einsum('bnk,bkd->bnd', A_out, state_out)
    a = jnp.concatenate([a_in, a_out, state_cur], axis=2)
    z = jax.nn.sigmoid(a @ wz + bz)
    r = jax.nn.sigmoid(a @ wr + br)
    a2 = jnp.concatenate([a_in, a_out, r * state_cur], axis=2)
    h_hat = jnp.tanh(a2 @ wh + bh)
    return (1.0 - z) * state_cur + z * h_hat


if __name__ == "__main__":
    # Small shapes consistent with the module (odd B exercises batch padding).
    B = 5
    state_dim = 32
    n_nodes = 8
    n_edge_types = 2
    NE = n_nodes * n_edge_types

    key = jax.random.PRNGKey(0)
    ks = jax.random.split(key, 10)

    state_in = jax.random.normal(ks[0], (B, NE, state_dim), jnp.float32)
    state_out = jax.random.normal(ks[1], (B, NE, state_dim), jnp.float32)
    state_cur = jax.random.normal(ks[2], (B, n_nodes, state_dim), jnp.float32)
    adj_matrix = jax.random.uniform(ks[3], (B, n_nodes, 2 * NE), jnp.float32)

    # Deterministic parameter init (PyTorch Linear-like uniform bound).
    bound = 1.0 / np.sqrt(3 * state_dim)

    def lin_params(kw, kb):
        # stored transposed: [3D, D] so that y = a @ w + b
        w = jax.random.uniform(kw, (3 * state_dim, state_dim), jnp.float32,
                               -bound, bound)
        b = jax.random.uniform(kb, (1, state_dim), jnp.float32, -bound, bound)
        return w, b

    wz, bz = lin_params(ks[4], ks[5])   # update_gate
    wr, br = lin_params(ks[6], ks[7])   # reset_gate
    wh, bh = lin_params(ks[8], ks[9])   # transform

    ref = prop_model_ref(state_in, state_out, state_cur, adj_matrix,
                         wz, bz, wr, br, wh, bh, n_nodes, n_edge_types)

    # f32 path: matches the reference at tight tolerance.
    out_f32 = jax.block_until_ready(
        prop_model_pallas(state_in, state_out, state_cur, adj_matrix,
                          wz, bz, wr, br, wh, bh,
                          compute_dtype=jnp.float32))
    np.testing.assert_allclose(np.asarray(out_f32), np.asarray(ref),
                               rtol=1e-5, atol=1e-5)

    # bf16 streamed-operand path (v6e/v7x recommendation): relaxed tolerance.
    out_bf16 = jax.block_until_ready(
        prop_model_pallas(state_in, state_out, state_cur, adj_matrix,
                          wz, bz, wr, br, wh, bh,
                          compute_dtype=jnp.bfloat16))
    np.testing.assert_allclose(np.asarray(out_bf16), np.asarray(ref),
                               rtol=1e-1, atol=1e-1)

    print("KERNEL_OK")
</pallas_src>

<mosaic_0001>
module attributes {stable_mosaic.version = 11 : i64} {
  func.func @_prop_kernel(%arg0: i32, %arg1: memref<3x8x32xf32, #tpu.memory_space<vmem>>, %arg2: memref<3x32x64xf32, #tpu.memory_space<vmem>>, %arg3: memref<3x8x32xf32, #tpu.memory_space<vmem>>, %arg4: memref<64x384xf32, #tpu.memory_space<vmem>>, %arg5: memref<32x256xf32, #tpu.memory_space<vmem>>, %arg6: memref<32x32xf32, #tpu.memory_space<vmem>>, %arg7: memref<1x384xf32, #tpu.memory_space<vmem>>, %arg8: memref<3x8x32xf32, #tpu.memory_space<vmem>>) attributes {dimension_semantics = [#tpu.dimension_semantics<parallel>], iteration_bounds = array<i64: 2>, scalar_prefetch = 0 : i64, scratch_operands = 0 : i64, tpu.core_type = #tpu.core_type<tc>, window_params = [{transform_indices = @transform_0, window_bounds = array<i64: 3, 8, 32>}, {transform_indices = @transform_1, window_bounds = array<i64: 3, 32, 64>}, {transform_indices = @transform_2, window_bounds = array<i64: 3, 8, 32>}, {pipeline_mode = #tpu.pipeline_mode<synchronous>, transform_indices = @transform_3, window_bounds = array<i64: 64, 384>}, {pipeline_mode = #tpu.pipeline_mode<synchronous>, transform_indices = @transform_4, window_bounds = array<i64: 32, 256>}, {pipeline_mode = #tpu.pipeline_mode<synchronous>, transform_indices = @transform_5, window_bounds = array<i64: 32, 32>}, {pipeline_mode = #tpu.pipeline_mode<synchronous>, transform_indices = @transform_6, window_bounds = array<i64: 1, 384>}, {transform_indices = @transform_7, window_bounds = array<i64: 3, 8, 32>}]} {
    %c0 = arith.constant 0 : index
    %c0_0 = arith.constant 0 : index
    %c0_1 = arith.constant 0 : index
    %0 = vector.load %arg1[%c0, %c0_0, %c0_1] : memref<3x8x32xf32, #tpu.memory_space<vmem>>, vector<3x8x32xf32>
    %c0_2 = arith.constant 0 : index
    %c0_3 = arith.constant 0 : index
    %c0_4 = arith.constant 0 : index
    %1 = vector.load %arg2[%c0_2, %c0_3, %c0_4] : memref<3x32x64xf32, #tpu.memory_space<vmem>>, vector<3x32x64xf32>
    %c0_5 = arith.constant 0 : index
    %c0_6 = arith.constant 0 : index
    %c0_7 = arith.constant 0 : index
    %2 = vector.load %arg3[%c0_5, %c0_6, %c0_7] : memref<3x8x32xf32, #tpu.memory_space<vmem>>, vector<3x8x32xf32>
    "tpu.trace_start"() <{level = 10 : i32, message = "bnk,bkd->bnd"}> : () -> ()
    %cst = arith.constant dense<0.000000e+00> : vector<3x8x64xf32>
    %3 = tpu.matmul %0, %1, %cst {dimension_numbers = #tpu.dot_dimension_numbers<[2], [1], [1], [2], [0, 0, 0, 1, 1, 2], [0], [0]>} : vector<3x8x32xf32>, vector<3x32x64xf32>, vector<3x8x64xf32> -> vector<3x8x64xf32>
    "tpu.trace_stop"() : () -> ()
    %4 = vector.shape_cast %3 : vector<3x8x64xf32> to vector<24x64xf32>
    %5 = vector.shape_cast %2 : vector<3x8x32xf32> to vector<24x32xf32>
    %c0_8 = arith.constant 0 : index
    %c0_9 = arith.constant 0 : index
    %6 = vector.load %arg4[%c0_8, %c0_9] : memref<64x384xf32, #tpu.memory_space<vmem>>, vector<64x384xf32>
    %cst_10 = arith.constant dense<0.000000e+00> : vector<24x384xf32>
    %7 = tpu.matmul %4, %6, %cst_10 {dimension_numbers = #tpu.dot_dimension_numbers<[1], [0], [0], [1], [0, 0, 1, 1], [], []>} : vector<24x64xf32>, vector<64x384xf32>, vector<24x384xf32> -> vector<24x384xf32>
    %c0_11 = arith.constant 0 : index
    %c0_12 = arith.constant 0 : index
    %8 = vector.load %arg7[%c0_11, %c0_12] : memref<1x384xf32, #tpu.memory_space<vmem>>, vector<1x384xf32>
    %9 = vector.broadcast %8 : vector<1x384xf32> to vector<24x384xf32>
    %10 = arith.addf %7, %9 : vector<24x384xf32>
    %c0_13 = arith.constant 0 : index
    %c0_14 = arith.constant 0 : index
    %11 = vector.load %arg5[%c0_13, %c0_14] : memref<32x256xf32, #tpu.memory_space<vmem>>, vector<32x256xf32>
    %cst_15 = arith.constant dense<0.000000e+00> : vector<24x256xf32>
    %12 = tpu.matmul %5, %11, %cst_15 {dimension_numbers = #tpu.dot_dimension_numbers<[1], [0], [0], [1], [0, 0, 1, 1], [], []>} : vector<24x32xf32>, vector<32x256xf32>, vector<24x256xf32> -> vector<24x256xf32>
    %13 = vector.extract_strided_slice %10 {offsets = [0, 0], sizes = [24, 32], strides = [1, 1]} : vector<24x384xf32> to vector<24x32xf32>
    %14 = vector.extract_strided_slice %12 {offsets = [0, 0], sizes = [24, 32], strides = [1, 1]} : vector<24x256xf32> to vector<24x32xf32>
    %15 = arith.addf %13, %14 : vector<24x32xf32>
    %16 = arith.negf %15 : vector<24x32xf32>
    %17 = math.exp %16 : vector<24x32xf32>
    %cst_16 = arith.constant 1.000000e+00 : f32
    %18 = vector.broadcast %cst_16 : f32 to vector<24x32xf32>
    %19 = arith.addf %18, %17 : vector<24x32xf32>
    %20 = arith.divf %18, %19 : vector<24x32xf32>
    %21 = vector.extract_strided_slice %10 {offsets = [0, 128], sizes = [24, 32], strides = [1, 1]} : vector<24x384xf32> to vector<24x32xf32>
    %22 = vector.extract_strided_slice %12 {offsets = [0, 128], sizes = [24, 32], strides = [1, 1]} : vector<24x256xf32> to vector<24x32xf32>
    %23 = arith.addf %21, %22 : vector<24x32xf32>
    %24 = arith.negf %23 : vector<24x32xf32>
    %25 = math.exp %24 : vector<24x32xf32>
    %cst_17 = arith.constant 1.000000e+00 : f32
    %26 = vector.broadcast %cst_17 : f32 to vector<24x32xf32>
    %27 = arith.addf %26, %25 : vector<24x32xf32>
    %28 = arith.divf %26, %27 : vector<24x32xf32>
    %29 = vector.extract_strided_slice %10 {offsets = [0, 256], sizes = [24, 32], strides = [1, 1]} : vector<24x384xf32> to vector<24x32xf32>
    %30 = arith.mulf %28, %5 : vector<24x32xf32>
    %c0_18 = arith.constant 0 : index
    %c0_19 = arith.constant 0 : index
    %31 = vector.load %arg6[%c0_18, %c0_19] : memref<32x32xf32, #tpu.memory_space<vmem>>, vector<32x32xf32>
    %cst_20 = arith.constant dense<0.000000e+00> : vector<24x32xf32>
    %32 = tpu.matmul %30, %31, %cst_20 {dimension_numbers = #tpu.dot_dimension_numbers<[1], [0], [0], [1], [0, 0, 1, 1], [], []>} : vector<24x32xf32>, vector<32x32xf32>, vector<24x32xf32> -> vector<24x32xf32>
    %33 = arith.addf %29, %32 : vector<24x32xf32>
    %34 = math.tanh %33 : vector<24x32xf32>
    %cst_21 = arith.constant 1.000000e+00 : f32
    %35 = vector.broadcast %cst_21 : f32 to vector<24x32xf32>
    %36 = arith.subf %35, %20 : vector<24x32xf32>
    %37 = arith.mulf %36, %5 : vector<24x32xf32>
    %38 = arith.mulf %20, %34 : vector<24x32xf32>
    %39 = arith.addf %37, %38 : vector<24x32xf32>
    %40 = vector.shape_cast %39 : vector<24x32xf32> to vector<3x8x32xf32>
    %c0_22 = arith.constant 0 : index
    %c0_23 = arith.constant 0 : index
    %c0_24 = arith.constant 0 : index
    %41 = vector.load %arg8[%c0_22, %c0_23, %c0_24] : memref<3x8x32xf32, #tpu.memory_space<vmem>>, vector<3x8x32xf32>
    tpu.vector_store %arg8[%c0_22, %c0_23, %c0_24], %40 {strides = array<i32>} : memref<3x8x32xf32, #tpu.memory_space<vmem>>, vector<3x8x32xf32>,
    return
  }
  func.func @transform_0(%arg0: i32) -> (i32, i32, i32) {
    %c0_i32 = arith.constant 0 : i32
    %c0_i32_0 = arith.constant 0 : i32
    %c0_i32_1 = arith.constant 0 : i32
    return %arg0, %c0_i32, %c0_i32_0 : i32, i32, i32
  }
  func.func @transform_1(%arg0: i32) -> (i32, i32, i32) {
    %c0_i32 = arith.constant 0 : i32
    %c0_i32_0 = arith.constant 0 : i32
    %c0_i32_1 = arith.constant 0 : i32
    return %arg0, %c0_i32, %c0_i32_0 : i32, i32, i32
  }
  func.func @transform_2(%arg0: i32) -> (i32, i32, i32) {
    %c0_i32 = arith.constant 0 : i32
    %c0_i32_0 = arith.constant 0 : i32
    %c0_i32_1 = arith.constant 0 : i32
    return %arg0, %c0_i32, %c0_i32_0 : i32, i32, i32
  }
  func.func @transform_3(%arg0: i32) -> (i32, i32) {
    %c0_i32 = arith.constant 0 : i32
    %c0_i32_0 = arith.constant 0 : i32
    %c0_i32_1 = arith.constant 0 : i32
    return %c0_i32, %c0_i32_0 : i32, i32
  }
  func.func @transform_4(%arg0: i32) -> (i32, i32) {
    %c0_i32 = arith.constant 0 : i32
    %c0_i32_0 = arith.constant 0 : i32
    %c0_i32_1 = arith.constant 0 : i32
    return %c0_i32, %c0_i32_0 : i32, i32
  }
  func.func @transform_5(%arg0: i32) -> (i32, i32) {
    %c0_i32 = arith.constant 0 : i32
    %c0_i32_0 = arith.constant 0 : i32
    %c0_i32_1 = arith.constant 0 : i32
    return %c0_i32, %c0_i32_0 : i32, i32
  }
  func.func @transform_6(%arg0: i32) -> (i32, i32) {
    %c0_i32 = arith.constant 0 : i32
    %c0_i32_0 = arith.constant 0 : i32
    %c0_i32_1 = arith.constant 0 : i32
    return %c0_i32, %c0_i32_0 : i32, i32
  }
  func.func @transform_7(%arg0: i32) -> (i32, i32, i32) {
    %c0_i32 = arith.constant 0 : i32
    %c0_i32_0 = arith.constant 0 : i32
    %c0_i32_1 = arith.constant 0 : i32
    return %arg0, %c0_i32, %c0_i32_0 : i32, i32, i32
  }
}

</mosaic_0001>

<bundles_post_ra>
// kernel: tpu_custom_call.1
= control target key start
LH: loop header
LB: loop body
LE: loop exit
PB: predicated region body
PF: predicated region fallthrough
CT: control target
= control target key end

     0   :  { %s2418_s0 = inlined_call_operand.hbm [shape: f32[6,8,32], index: 0, kind: input, shape index: {}]   ;;  %s2419_s1 = inlined_call_operand.hbm [shape: f32[6,32,64], index: 1, kind: input, shape index: {}]   ;;  %s2420_s2 = inlined_call_operand.hbm [shape: f32[6,8,32], index: 2, kind: input, shape index: {}]   ;;  %s2421_s3 = inlined_call_operand.hbm [shape: f32[64,384], index: 3, kind: input, shape index: {}]   ;;  %s2422_s4 = inlined_call_operand.hbm [shape: f32[32,256], index: 4, kind: input, shape index: {}]   ;;  %s2423_s5 = inlined_call_operand.hbm [shape: f32[32,32], index: 5, kind: input, shape index: {}]   ;;  %s2424_s6 = inlined_call_operand.vmem [shape: f32[1,384], index: 6, kind: input, shape index: {}]   ;;  %s2425_s7 = inlined_call_operand.hbm [shape: f32[6,8,32], index: 7, kind: output, shape index: {}]  }
   0x1   :  { %2450 = sst [smem:[#allocation25_spill]] %s2419_s1 }
   0x2   :  { %2451 = sst [smem:[#allocation26_spill]] %s2421_s3 }
   0x3   :  { %2452 = sst [smem:[#allocation27_spill]] %s2424_s6 }
   0x4   :  { %2453 = sst [smem:[#allocation28_spill]] %s2425_s7 }
   0x5   :  { %12 = vsyncpa [#allocation3], 0 }
   0x6   :  { %14 = vsyncpa [#allocation3 + $0x1], 0 }
   0x7   :  { %15 = vsyncpa [#allocation6], 0 }
   0x8   :  { %17 = vsyncpa [#allocation6 + $0x1], 0 }
   0x9   :  { %18 = vsyncpa [#allocation9], 0 }
   0xa   :  { %19 = vsyncpa [#allocation12], 0 }
   0xb   :  { %20 = vsyncpa [#allocation4], 0 }
   0xc   :  { %22 = vsyncpa [#allocation4 + $0x1], 0  ;;  %s1974_s24 = smov 0   ;;  %s1976_s25 = smov 0  }
   0xd   :  { %s1978_s26 = smov 0   ;;  %s1980_s27 = smov 0  }
   0xe LB: > { %2454 = sst [smem:[#allocation19_spill]] %s1902_s24  ;;  %s1995_s28 = sadd.s32 4294967295, %s1914_s27   ;;  %s1914_s27 = sphi %s1980_s27, %s2493_s27   ;;  %s1910_s26 = sphi %s1978_s26, %s2495_s26   ;;  %s1906_s25 = sphi %s1976_s25, %s2497_s25   ;;  %s1902_s24 = sphi %s1974_s24, %s2496_s24  }
   0xf   : > { %2455 = sst [smem:[#allocation20_spill]] %s1910_s26  ;;  %s1293_s29 = sadd.s32 4294967294, %s1914_s27  }
  0x10   : > { %s1999_s30 = sadd.s32 1, %s1914_s27   ;;  %s35_s8 = sadd.s32 1, %s1910_s26 }
  0x11   : > { %2456 = sst [smem:[#allocation21_spill]] %s1999_s30  ;;  %s32_s9 = ssub.s32 %s1914_s27, %s1999_s30 }
  0x12   : > { %p42_p0 = scmp.ne.s32.totalorder %s1910_s26, %s1906_s25  ;;  %p33_p1 = scmp.eq.s32.totalorder %s32_s9, 0 }
  0x13   : > { %p43_p2 = scmp.eq.s32.totalorder %s1914_s27, 0  ;;  %p48_p3 = scmp.ne.s32.totalorder %s1906_s25, %s1902_s24 }
  0x14   : > { %p2426_p4 = scmp.eq.s32.totalorder %s1995_s28, 0  ;;  %p208_p7 = scmp.eq.s32.totalorder %s1995_s28, 1 }
  0x15   : > { %s2011_s10 = scalar_select %p33_p1, %s1910_s26, %s35_s8  }
  0x16   : > { %p2013_p5 = por %p43_p2, %p42_p0  ;;  %p2019_p6 = por %p2426_p4, %p48_p3 }
  0x17   : > { %2457 = sst [smem:[#allocation22_spill]] %s2011_s10  ;;  %p214_p8 = scmp.eq.s32.totalorder %s1293_s29, 1 }
  0x18   : > { %s2458_s11 = scalar_select %p2013_p5, 1, 0 }
  0x19   : > { %s2459_s12 = scalar_select %p2019_p6, 1, 0 }
  0x1a   : > { %p1294_p9 = scmp.ge.s32.totalorder %s1914_s27, 1  ;;  %p221_p10 = scmp.lt.s32.totalorder %s1914_s27, 3 }
  0x1b   : > { %p2026_p11 = por %p208_p7, %p42_p0  ;;  %p2030_p12 = por %p214_p8, %p48_p3 }
  0x1c   : > { %p2034_p13 = pnand %p1294_p9, %p221_p10  ;;  %s1916_s16 = smov [#allocation8]  }
  0x1d   : > { %s2460_s13 = scalar_select %p2026_p11, 1, 0 }
  0x1e   : > { %s2462_s14 = scalar_select %p2030_p12, 1, 0 }
  0x1f   : > { %2461 = sst [smem:[#allocation23_spill]] %s2460_s13  ;;  %p1554_p1 = pneg %p2034_p13 }
  0x20   : > { %2463 = sst [smem:[#allocation24_spill]] %s2462_s14  ;;  %s233_s17 = sshll.u32 %s1916_s16, 4  ;;  %s234_s17 = int_to_ptr.vmem [resolvable:$true] %s233_s17 }
  0x21   : > { %s2464_s15 = scalar_select %p2034_p13, 1, 0 }
  0x22   : > { %p2042_p2 = pnand %p1554_p1, %p2426_p4  ;;  %s2466_s3 = sld [smem:[#allocation26_spill]] }
  0x24   : > { %s2465_s18 = scalar_select %p2042_p2, 1, 0 }
  0x25   : > { %p2056_p8 = pneg %p2042_p2 }
  0x27   : > { %s2467_s29 = scalar_select %p2056_p8, 1, 0 }
  0x28   : > { %s1662_s21 = scalar_lea.hbm %s2466_s3, 3072 }
  0x29   : > { %p1663_p7 = scmp.ne.s32.totalorder %s2466_s3, %s1662_s21  ;;  %p1669_p1 = scmp.lt.u32.totalorder %s1662_s21, %s2466_s3 }
  0x2b   : > { %p1665_p9 = pnand %p2056_p8, %p1663_p7 }
  0x2d   : > { %p1666_p10 = pneg %p1665_p9 }
  0x2f   : > { %p1671_p0 = pnand %p1669_p1, %p1666_p10 }
  0x31   : > { %1674 = shalt.err (!%p1671_p0)
}
  0x32   : > { %s1675_s16 = scalar_lea.vmem %s234_s17, 3072  ;;  %p1683_p11 = scmp.lt.s32.totalorder %s234_s17, %s234_s17 }
  0x33   : > { %p1676_p4 = scmp.ne.s32.totalorder %s234_s17, %s1675_s16  ;;  %p1684_p6 = scmp.lt.s32.totalorder %s1675_s16, %s1675_s16 }
  0x35   : > { %p1678_p3 = pnand %p1676_p4, %p2056_p8  ;;  %p1685_p13 = por %p1684_p6, %p1683_p11 }
  0x37   : > { %p1679_p12 = pneg %p1678_p3 }
  0x39   : > { %p1686_p5 = pnand %p1685_p13, %p1679_p12 }
  0x3b   : > { %1689 = shalt.err (!%p1686_p5)
}
  0x3c   : > { %s1917_s19 = smov 384   ;;  %s1918_s20 = smov 24  }
  0x3d   : > { %1557 = dma.hbm_to_vmem [thread:$0]  (!%p2042_p2), %s2466_s3, 3072, %s234_s17, [#allocation9], %s1917_s19, %s1917_s19, %s1918_s20  }
  0x3e   : > { %s2073_s23 = sand.u32 1, %s1910_s26   ;;  %p2468_p4 = scmp.ne.s32.totalorder %s2458_s11, 0 }
  0x3f   : > { %p2469_p0 = scmp.lt.s32.totalorder %s1914_s27, 2  ;;  %s297_s9 = sand.u32 1, %s1914_s27  }
  0x40   : > { %s1530_s16 = smul.u32 96, %s2073_s23  ;;  %s2471_s1 = sld [smem:[#allocation25_spill]] }
  0x41   : > { %p2079_p6 = pnand %p2469_p0, %p2468_p4  ;;  %s1336_s10 = smul.u32 1536, %s1914_s27 }
  0x42   : > { %s301_s30 = scalar_lea.vmem [#allocation5], %s1530_s16  ;;  %s2093_s11 = scalar_lea.sflag [#allocation6], %s297_s9 }
  0x43   : > { %s2470_s8 = scalar_select %p2079_p6, 1, 0 }
  0x44   : > { %s309_s14 = sshll.u32 %s301_s30, 4  ;;  %p2099_p11 = pneg %p2079_p6  ;;  %s2091_s14 = int_to_ptr.vmem [resolvable:$true] %s309_s14 }
  0x46   : > { %s2089_s21 = scalar_lea.hbm %s2471_s1, %s1336_s10  ;;  %s1695_s30 = scalar_lea.hbm %s2471_s1, 3072 }
  0x47   : > { %s1690_s17 = scalar_lea.hbm %s2089_s21, 1536  ;;  %p1696_p3 = scmp.lt.u32.totalorder %s2089_s21, %s2471_s1 }
  0x48   : > { %p1691_p5 = scmp.ne.s32.totalorder %s2089_s21, %s1690_s17  ;;  %p1697_p7 = scmp.lt.u32.totalorder %s1695_s30, %s1690_s17 }
  0x49   : > { %s2472_s19 = scalar_select %p2099_p11, 1, 0 }
  0x4a   : > { %p1693_p12 = pnand %p2099_p11, %p1691_p5  ;;  %p1698_p9 = por %p1697_p7, %p1696_p3 }
  0x4b   : > { %p1699_p10 = scmp.lt.u32.totalorder %s1690_s17, %s2089_s21 }
  0x4c   : > { %p1694_p13 = pneg %p1693_p12 }
  0x4d   : > { %p1700_p1 = por %p1699_p10, %p1698_p9 }
  0x4f   : > { %p1701_p4 = pnand %p1700_p1, %p1694_p13 }
  0x51   : > { %1704 = shalt.err (!%p1701_p4)
}
  0x52   : > { %s1705_s22 = scalar_lea.vmem %s2091_s14, 1536  ;;  %s1919_s9 = smov [#allocation5]  }
  0x53   : > { %p1706_p0 = scmp.ne.s32.totalorder %s2091_s14, %s1705_s22  ;;  %s1710_s16 = sshll.u32 %s1919_s9, 4  ;;  %s1711_s16 = int_to_ptr.vmem [resolvable:$false] %s1710_s16 }
  0x54   : > { %s1712_s7 = scalar_lea.vmem %s1711_s16, 3072  ;;  %p1713_p2 = scmp.lt.s32.totalorder %s2091_s14, %s1711_s16 }
  0x55   : > { %p1708_p5 = pnand %p1706_p0, %p2099_p11  ;;  %p1714_p8 = scmp.lt.s32.totalorder %s1712_s7, %s1705_s22 }
  0x57   : > { %p1709_p12 = pneg %p1708_p5  ;;  %p1715_p3 = por %p1714_p8, %p1713_p2 }
  0x59   : > { %p1716_p7 = pnand %p1715_p3, %p1709_p12 }
  0x5b   : > { %1719 = shalt.err (!%p1716_p7)
}
  0x5c   : > { %s2441_s17 = smov 128   ;;  %s2443_s24 = smov 8  }
  0x5d   : > { %1570 = dma.hbm_to_vmem [thread:$0]  (!%p2079_p6), %s2089_s21, 1536, %s2091_s14, %s2093_s11, %s2441_s17, %s2441_s17, %s2443_s24  }
  0x5e   : > { %s1922_s30 = smov [#allocation10]   ;;  %s1720_s9 = scalar_lea.hbm %s2422_s4, 1024 }
  0x5f   : > { %s246_s10 = sshll.u32 %s1922_s30, 4  ;;  %p1721_p2 = scmp.ne.s32.totalorder %s2422_s4, %s1720_s9  ;;  %s247_s10 = int_to_ptr.vmem [resolvable:$true] %s246_s10 }
  0x60   : > { %p2473_p8 = scmp.ne.s32.totalorder %s2467_s29, 0  ;;  %p1727_p10 = scmp.lt.u32.totalorder %s1720_s9, %s2422_s4 }
  0x62   : > { %p1723_p13 = pnand %p1721_p2, %p2473_p8 }
  0x64   : > { %p1724_p9 = pneg %p1723_p13 }
  0x66   : > { %p1729_p1 = pnand %p1727_p10, %p1724_p9 }
  0x68   : > { %1732 = shalt.err (!%p1729_p1)
}
  0x69   : > { %s1733_s14 = scalar_lea.vmem %s247_s10, 1024  ;;  %p1741_p12 = scmp.lt.s32.totalorder %s247_s10, %s247_s10 }
  0x6a   : > { %p1734_p4 = scmp.ne.s32.totalorder %s247_s10, %s1733_s14  ;;  %p1742_p3 = scmp.lt.s32.totalorder %s1733_s14, %s1733_s14 }
  0x6c   : > { %p1736_p0 = pnand %p1734_p4, %p2473_p8  ;;  %p1743_p7 = por %p1742_p3, %p1741_p12 }
  0x6e   : > { %p1737_p5 = pneg %p1736_p0 }
  0x70   : > { %p1744_p6 = pnand %p1743_p7, %p1737_p5 }
  0x72   : > { %1747 = shalt.err (!%p1744_p6)
}
  0x73   : > { %s1923_s21 = smov 256   ;;  %s1924_s1 = smov 16  }
  0x74   : > { %p2474_p2 = scmp.ne.s32.totalorder %s2465_s18, 0  ;;  %s1925_s20 = smov [#allocation11]  }
  0x75   : > { %s259_s22 = sshll.u32 %s1925_s20, 4  ;;  %s1529_s9 = smul.u32 24, %s2073_s23  ;;  %s260_s22 = int_to_ptr.vmem [resolvable:$true] %s259_s22 }
  0x76   : > { %1560 = dma.hbm_to_vmem [thread:$0]  (!%p2474_p2), %s2422_s4, 1024, %s247_s10, [#allocation9], %s1923_s21, %s1923_s21, %s1924_s1  }
  0x77   : > { %s1331_s16 = smul.u32 384, %s1914_s27  ;;  %s1748_s17 = scalar_lea.hbm %s2423_s5, 512 }
  0x78   : > { %p1749_p6 = scmp.ne.s32.totalorder %s2423_s5, %s1748_s17  ;;  %p1755_p10 = scmp.lt.u32.totalorder %s1748_s17, %s2423_s5 }
  0x7a   : > { %p1751_p13 = pnand %p1749_p6, %p2473_p8 }
  0x7c   : > { %p1752_p9 = pneg %p1751_p13 }
  0x7e   : > { %p1757_p1 = pnand %p1755_p10, %p1752_p9 }
  0x80   : > { %1760 = shalt.err (!%p1757_p1)
}
  0x81   : > { %s1761_s10 = scalar_lea.vmem %s260_s22, 512  ;;  %p1769_p12 = scmp.lt.s32.totalorder %s260_s22, %s260_s22 }
  0x82   : > { %p1762_p4 = scmp.ne.s32.totalorder %s260_s22, %s1761_s10  ;;  %p1770_p3 = scmp.lt.s32.totalorder %s1761_s10, %s1761_s10 }
  0x84   : > { %p1764_p0 = pnand %p1762_p4, %p2473_p8  ;;  %p1771_p7 = por %p1770_p3, %p1769_p12 }
  0x86   : > { %p1765_p5 = pneg %p1764_p0 }
  0x88   : > { %p1772_p11 = pnand %p1771_p7, %p1765_p5 }
  0x8a   : > { %1775 = shalt.err (!%p1772_p11)
}
  0x8b   : > { %s2475_s26 = smov 8   ;;  %s2476_s24 = smov 128  }
  0x8c   : > { %1563 = dma.hbm_to_vmem [thread:$0]  (!%p2474_p2), %s2423_s5, 512, %s260_s22, [#allocation12], %s2476_s24, %s2476_s24, %s2475_s26  }
  0x8d   : > { %s2170_s21 = scalar_lea.hbm %s2418_s0, %s1331_s16  ;;  %s280_s18 = scalar_lea.vmem [#allocation2], %s1529_s9 }
  0x8e   : > { %s287_s1 = sshll.u32 %s280_s18, 4  ;;  %s2179_s20 = scalar_lea.hbm %s2420_s2, %s1331_s16  ;;  %s2174_s1 = int_to_ptr.vmem [resolvable:$true] %s287_s1 }
  0x8f   : > { %s277_s22 = scalar_lea.sflag [#allocation3], %s2073_s23  ;;  %s1776_s7 = scalar_lea.hbm %s2170_s21, 384 }
  0x90   : > { %p1777_p11 = scmp.ne.s32.totalorder %s2170_s21, %s1776_s7  ;;  %p2477_p8 = scmp.ne.s32.totalorder %s2472_s19, 0 }
  0x91   : > { %s1781_s6 = scalar_lea.hbm %s2418_s0, 768  ;;  %p1782_p13 = scmp.lt.u32.totalorder %s2170_s21, %s2418_s0 }
  0x92   : > { %p1779_p2 = pnand %p1777_p11, %p2477_p8  ;;  %p1783_p9 = scmp.lt.u32.totalorder %s1781_s6, %s1776_s7 }
  0x93   : > { %p1785_p1 = scmp.lt.u32.totalorder %s1776_s7, %s2170_s21 }
  0x94   : > { %p1780_p6 = pneg %p1779_p2  ;;  %p1784_p10 = por %p1783_p9, %p1782_p13 }
  0x96   : > { %p1786_p4 = por %p1785_p1, %p1784_p10 }
  0x98   : > { %p1787_p0 = pnand %p1786_p4, %p1780_p6 }
  0x9a   : > { %1790 = shalt.err (!%p1787_p0)
}
  0x9b   : > { %s1791_s16 = scalar_lea.vmem %s2174_s1, 384  ;;  %s1926_s17 = smov [#allocation2]  }
  0x9c   : > { %p1792_p5 = scmp.ne.s32.totalorder %s2174_s1, %s1791_s16  ;;  %s1796_s18 = sshll.u32 %s1926_s17, 4  ;;  %s1797_s18 = int_to_ptr.vmem [resolvable:$false] %s1796_s18 }
  0x9d   : > { %s1798_s3 = scalar_lea.vmem %s1797_s18, 768  ;;  %p1799_p7 = scmp.lt.s32.totalorder %s2174_s1, %s1797_s18 }
  0x9e   : > { %p1794_p12 = pnand %p1792_p5, %p2477_p8  ;;  %p1800_p11 = scmp.lt.s32.totalorder %s1798_s3, %s1791_s16 }
  0xa0   : > { %p1795_p3 = pneg %p1794_p12  ;;  %p1801_p2 = por %p1800_p11, %p1799_p7 }
  0xa2   : > { %p1802_p13 = pnand %p1801_p2, %p1795_p3 }
  0xa4   : > { %1805 = shalt.err (!%p1802_p13)
}
  0xa5   : > { %p2478_p6 = scmp.ne.s32.totalorder %s2470_s8, 0  ;;  %s323_s30 = scalar_lea.vmem [#allocation7], %s1529_s9 }
  0xa6   : > { %s330_s7 = sshll.u32 %s323_s30, 4  ;;  %s1806_s14 = scalar_lea.hbm %s2179_s20, 384  ;;  %s2210_s7 = int_to_ptr.vmem [resolvable:$true] %s330_s7 }
  0xa7   : > { %1567 = dma.hbm_to_vmem [thread:$0]  (!%p2478_p6), %s2170_s21, 384, %s2174_s1, %s277_s22, %s2476_s24, %s2476_s24, %s2475_s26  }
  0xa8   : > { %p1807_p9 = scmp.ne.s32.totalorder %s2179_s20, %s1806_s14  ;;  %s1811_s13 = scalar_lea.hbm %s2420_s2, 768 }
  0xa9   : > { %p1812_p4 = scmp.lt.u32.totalorder %s2179_s20, %s2420_s2  ;;  %p1813_p0 = scmp.lt.u32.totalorder %s1811_s13, %s1806_s14 }
  0xaa   : > { %p1809_p10 = pnand %p1807_p9, %p2477_p8  ;;  %p1815_p12 = scmp.lt.u32.totalorder %s1806_s14, %s2179_s20 }
  0xab   : > { %p1814_p5 = por %p1813_p0, %p1812_p4 }
  0xac   : > { %p1810_p1 = pneg %p1809_p10 }
  0xad   : > { %p1816_p3 = por %p1815_p12, %p1814_p5 }
  0xaf   : > { %p1817_p7 = pnand %p1816_p3, %p1810_p1 }
  0xb1   : > { %1820 = shalt.err (!%p1817_p7)
}
  0xb2   : > { %s1821_s23 = scalar_lea.vmem %s2210_s7, 384  ;;  %s1927_s9 = smov [#allocation7]  }
  0xb3   : > { %p1822_p11 = scmp.ne.s32.totalorder %s2210_s7, %s1821_s23  ;;  %s1826_s21 = sshll.u32 %s1927_s9, 4  ;;  %s1827_s21 = int_to_ptr.vmem [resolvable:$false] %s1826_s21 }
  0xb4   : > { %s1828_s1 = scalar_lea.vmem %s1827_s21, 768  ;;  %p1829_p9 = scmp.lt.s32.totalorder %s2210_s7, %s1827_s21 }
  0xb5   : > { %p1824_p2 = pnand %p1822_p11, %p2477_p8  ;;  %p1830_p10 = scmp.lt.s32.totalorder %s1828_s1, %s1821_s23 }
  0xb7   : > { %p1825_p13 = pneg %p1824_p2  ;;  %p1831_p4 = por %p1830_p10, %p1829_p9 }
  0xb9   : > { %p1832_p0 = pnand %p1831_p4, %p1825_p13 }
  0xbb   : > { %1835 = shalt.err (!%p1832_p0)
}
  0xbc   : > { %1573 = dma.hbm_to_vmem [thread:$0]  (!%p2478_p6), %s2179_s20, 384, %s2210_s7, %s2093_s11, %s2476_s24, %s2476_s24, %s2475_s26  }
  0xbd   : > { %p2479_p8 = scmp.ne.s32.totalorder %s2464_s15, 0 }
  0xbe   : > { %s2240_s19 = sand.u32 (!%p2479_p8), 1, %s1906_s25   ;;  %p2480_p1 = scmp.ne.s32.totalorder (!%p2479_p8), %s2459_s12, 0 }
  0xbf   : > { %342 = sbr.rel (%p2479_p8) target bundleno = 940 (0x3ac), region = 48  ;;  %s345_s8 = scalar_lea.sflag (!%p2479_p8), [#allocation3], %s2240_s19 }
  0xc0   : > { %s2243_s22 = smul.u32 (!%p2479_p8), 24, %s2240_s19 }
  0xc2   : > { %s2247_s17 = scalar_lea.vmem (!%p2479_p8), [#allocation2], %s2243_s22 }
  0xc6   : > { %1881 = dma.done.wait (%p2480_p1), %s345_s8, 384  }
  0xc7   : > { %1883 = vsyncadd (%p2480_p1), %s345_s8, 4294966912  ;;  %s353_s15 = sand.u32 1, %s1995_s28   ;;  %s1533_s11 = smul.u32 96, %s2240_s19 }
  0xc8   : > { %s354_s26 = scalar_lea.sflag [#allocation6], %s353_s15 }
  0xc9   : > { %s2255_s24 = scalar_lea.vmem [#allocation5], %s1533_s11 }
  0xca   : > { %1885 = dma.done.wait (%p2480_p1), %s354_s26, 1920  }
  0xcb   : > { %1887 = vsyncadd (%p2480_p1), %s354_s26, 4294965376  ;;  %s2262_s20 = scalar_lea.vmem [#allocation7], %s2243_s22  ;;  %p2481_p6 = scmp.eq.s32.totalorder %s1995_s28, 0 }
  0xcd   : > { %1889 = dma.done.wait (%p2481_p6), [#allocation9], 4096   ;;  %p2482_p5 = pmov %p2481_p6 }
  0xcf   : > { %1891 = vsyncadd (%p2482_p5), [#allocation9], 4294963200  ;;  %p2483_p12 = pmov %p2482_p5 }
  0xd0   : > { %p2484_p3 = pmov %p2482_p5 }
  0xd1   : > { %1893 = dma.done.wait (%p2483_p12), [#allocation12], 512  }
  0xd2   : > { %1895 = vsyncadd (%p2484_p3), [#allocation12], 4294966784  ;;  %v1928_v0 = vmov 0.0|0.0   ;;  %vm1929_vm0 = vmmov 0   ;;  %v1930_v1 = vmov 0.0   ;;  %v426_v2 = vld [vmem:[%s2255_s24] sm:$0xff] }
  0xd3   : > { %1445 = vmatprep.subr.bf16.mxu0 %v1928_v0  ;;  %1451 = vmatprep.subr.bf16.mxu1 %v1928_v0  ;;  %v427_v3 = vld [vmem:[%s2255_s24 + $0x8] sm:$0xff]  ;;  %v430_v4 = vld [vmem:[%s2255_s24 + $0x20] sm:$0xff]  ;;  %v428_v7 = vld [vmem:[%s2255_s24 + $0x10] sm:$0xff]  ;;  %vm441_vm1 = vcmask 261120   ;;  %vm702_vm2 = vcmask 523264   ;;  %s2485_s3 = sld [smem:[#allocation27_spill]] }
  0xd4   : > { %1378 = vmatprep.mubr.msk.f32.mxu0 %vm1929_vm0, %v1930_v1  ;;  %1389 = vmatprep.mubr.msk.f32.mxu1 %vm1929_vm0, %v1930_v1  ;;  %v1446_v5 = vpack.c.bf16 %v427_v3, %v426_v2  ;;  %v431_v6 = vld [vmem:[%s2255_s24 + $0x28] sm:$0xff]  ;;  %v429_v8 = vld [vmem:[%s2255_s24 + $0x18] sm:$0xff]  ;;  %v432_v10 = vld [vmem:[%s2255_s24 + $0x30] sm:$0xff]  ;;  %s418_s30 = scalar_lea.vmem [#allocation13], %s2243_s22  ;;  %s2486_s7 = sld [smem:[#allocation23_spill]] }
  0xd5   : > { %v1452_v9 = vpack.c.bf16 %v431_v6, %v430_v4  ;;  %v433_v11 = vld [vmem:[%s2255_s24 + $0x38] sm:$0xff]  ;;  %v1449_v12 = vpack.c.bf16 %v429_v8, %v428_v7  ;;  %v434_v14 = vld [vmem:[%s2255_s24 + $0x40] sm:$0xff]  ;;  %v435_v15 = vld [vmem:[%s2255_s24 + $0x48] sm:$0xff]  ;;  %s1335_s14 = smul.u32 384, %s1995_s28  ;;  %s1148_s10 = sshll.u32 %s418_s30, 4  ;;  %s2373_s10 = int_to_ptr.vmem [resolvable:$true] %s1148_s10 }
  0xd6   : > { %1447 = vmatpush3.bf16.msra.mxu0 %v1446_v5  ;;  %v1455_v13 = vpack.c.bf16 %v433_v11, %v432_v10  ;;  %v662_v16 = vld [vmem:[#allocation8 + $0x8] sm:$0xff]  ;;  %v665_v17 = vld [vmem:[#allocation8 + $0x20] sm:$0xff]  ;;  %v664_v20 = vld [vmem:[#allocation8 + $0x18] sm:$0xff]  ;;  %v1458_v22 = vpack.c.bf16 %v435_v15, %v434_v14  ;;  %s2487_s29 = sld [smem:[#allocation28_spill]]  ;;  %s1135_s28 = scalar_lea.sflag [#allocation4], %s2240_s19 }
  0xd7   : > { %1448 = vmatprep.subr.bf16.mxu0 %v1928_v0  ;;  %1453 = vmatpush3.bf16.msra.mxu1 %v1452_v9  ;;  %v1463_v18 = vpack.c.bf16 %v665_v17, %v662_v16  ;;  %v661_v19 = vld [vmem:[#allocation8] sm:$0xff]  ;;  %v668_v23 = vld [vmem:[#allocation8 + $0x38] sm:$0xff]  ;;  %v671_v24 = vld [vmem:[#allocation8 + $0x50] sm:$0xff]  ;;  %s1836_s23 = scalar_lea.vmem %s2373_s10, 384  ;;  %s1931_s9 = smov [#allocation13]  }
  0xd8   : > { %1454 = vmatprep.subr.bf16.mxu1 %v1928_v0  ;;  %v423_v21 = vld [vmem:[%s2247_s17] sm:$0xff]  ;;  %v424_v25 = vld [vmem:[%s2247_s17 + $0x8] sm:$0xff]  ;;  %v1465_v28 = vpack.c.bf16 %v664_v20, %v661_v19  ;;  %v1467_v29 = vpack.c.bf16 %v671_v24, %v668_v23  ;;  %v667_v30 = vld [vmem:[#allocation8 + $0x30] sm:$0xff]  ;;  %v687_v24 = vlaneseq  ;;  %p1837_p7 = scmp.ne.s32.totalorder %s2373_s10, %s1836_s23  ;;  %s1840_s21 = sshll.u32 %s1931_s9, 4  ;;  %s1841_s21 = int_to_ptr.vmem [resolvable:$false] %s1840_s21 }
  0xd9   : > { %v436_v26 = vld [vmem:[%s2255_s24 + $0x50] sm:$0xff]  ;;  %v437_v27 = vld [vmem:[%s2255_s24 + $0x58] sm:$0xff]  ;;  %v663_v35 = vld [vmem:[#allocation8 + $0x10] sm:$0xff]  ;;  %s1842_s1 = scalar_lea.vmem %s1841_s21, 768  ;;  %p1843_p9 = scmp.lt.s32.totalorder %s2373_s10, %s1841_s21 }
  0xda   : > { %1450 = vmatpush3.bf16.msra.mxu0 %v1449_v12  ;;  %v670_v31 = vld [vmem:[#allocation8 + $0x48] sm:$0xff]  ;;  %v1461_v32 = vpack.c.bf16 %v437_v27, %v436_v26  ;;  %v677_v34 = vld [vmem:[#allocation8 + $0x80] sm:$0xff]  ;;  %v676_v40 = vld [vmem:[#allocation8 + $0x78] sm:$0xff]  ;;  %p2488_p11 = scmp.ne.s32.totalorder %s2486_s7, 0  ;;  %p1844_p10 = scmp.lt.s32.totalorder %s1842_s1, %s1836_s23 }
  0xdb   : > { %1456 = vmatpush3.bf16.msra.mxu1 %v1455_v13  ;;  %1457 = vmatprep.subr.bf16.mxu0 %v1928_v0  ;;  %v674_v33 = vld [vmem:[#allocation8 + $0x68] sm:$0xff]  ;;  %v1469_v37 = vpack.c.bf16 %v670_v31, %v667_v30  ;;  %v673_v39 = vld [vmem:[#allocation8 + $0x60] sm:$0xff]  ;;  %v680_v43 = vld [vmem:[#allocation8 + $0x98] sm:$0xff] }
  0xdc   : > { %1464 = vmatprep.subr.bf16.mxu1 %v1463_v18  ;;  %v666_v36 = vld [vmem:[#allocation8 + $0x28] sm:$0xff]  ;;  %v1471_v38 = vpack.c.bf16 %v677_v34, %v674_v33  ;;  %v683_v44 = vld [vmem:[#allocation8 + $0xb0] sm:$0xff]  ;;  %v669_v45 = vld [vmem:[#allocation8 + $0x40] sm:$0xff]  ;;  %v1473_v47 = vpack.c.bf16 %v676_v40, %v673_v39  ;;  %s2371_s16 = scalar_lea.hbm %s2487_s29, %s1335_s14  ;;  %p1838_p2 = pnand %p1837_p7, %p2488_p11 }
  0xdd   : > { %1379 = vmatmul.mubr.msk.f32.vlgmr.msra.gmra.mrb[0].mxu0 %vm441_vm1, %v423_v21  ;;  %v425_v41 = vld [vmem:[%s2247_s17 + $0x10] sm:$0xff]  ;;  %v1480_v42 = vpack.c.bf16 %v666_v36, %v663_v35  ;;  %v672_v46 = vld [vmem:[#allocation8 + $0x58] sm:$0xff]  ;;  %v1475_v48 = vpack.c.bf16 %v683_v44, %v680_v43  ;;  %v681_v56 = vld [vmem:[#allocation8 + $0xa0] sm:$0xff]  ;;  %p1845_p4 = por %p1844_p10, %p1843_p9 }
  0xde   : > { %1459 = vmatpush3.bf16.msra.mxu0 %v1458_v22  ;;  %1390 = vmatmul.mubr.msk.f32.vlgmr.msra.gmra.mrb[0].mxu1 %vm441_vm1, %v424_v25  ;;  %v679_v49 = vld [vmem:[#allocation8 + $0x90] sm:$0xff]  ;;  %v682_v50 = vld [vmem:[#allocation8 + $0xa8] sm:$0xff]  ;;  %v1483_v51 = vpack.c.bf16 %v672_v46, %v669_v45  ;;  %v684_v57 = vld [vmem:[#allocation8 + $0xb8] sm:$0xff]  ;;  %v688_v25 = vshrl.u32 %v687_v24, 7  ;;  %p1839_p13 = pneg %p1838_p2 }
  0xdf   : > { %1460 = vmatprep.subr.bf16.mxu0 %v1928_v0  ;;  %1400 = vmatprep.mubr.msk.f32.mxu0 %vm1929_vm0, %v1930_v1  ;;  %v675_v52 = vld [vmem:[#allocation8 + $0x70] sm:$0xff]  ;;  %v678_v53 = vld [vmem:[#allocation8 + $0x88] sm:$0xff]  ;;  %v1477_v54 = vpack.c.bf16 %v682_v50, %v679_v49  ;;  %v1489_v58 = vpack.c.bf16 %v684_v57, %v681_v56  ;;  %v878_v60 = vld [vmem:[#allocation10 + $0x18] sm:$0xff] }
  0xe0   : > { %1466 = vmatpush1.bf16.msra.mxu1 %v1465_v28  ;;  %776 = vmatprep.mubr.f32.mxu1 %v1930_v1  ;;  %v1486_v55 = vpack.c.bf16 %v678_v53, %v675_v52  ;;  %v876_v59 = vld [vmem:[#allocation10 + $0x8] sm:$0xff]  ;;  %v875_v62 = vld [vmem:[#allocation10] sm:$0xff]  ;;  %v877_v63 = vld [vmem:[#allocation10 + $0x10] sm:$0xff]  ;;  %v693_v26 = vsub.s32 1, %v688_v25  ;;  %p1846_p0 = pnand %p1845_p4, %p1839_p13 }
  0xe1   : > { %1468 = vmatprep.subr.bf16.mxu1 %v1467_v29  ;;  %v1491_v61 = vpack.c.bf16 %v878_v60, %v876_v59  ;;  %v880_v2 = vld [vmem:[#allocation10 + $0x28] sm:$0xff]  ;;  %v882_v3 = vld [vmem:[#allocation10 + $0x38] sm:$0xff]  ;;  %v1493_v4 = vpack.c.bf16 %v877_v63, %v875_v62  ;;  %v879_v6 = vld [vmem:[#allocation10 + $0x20] sm:$0xff] }
  0xe2   : > { %1462 = vmatpush3.bf16.msra.mxu0 %v1461_v32  ;;  %v1495_v5 = vpack.c.bf16 %v882_v3, %v880_v2  ;;  %v881_v7 = vld [vmem:[#allocation10 + $0x30] sm:$0xff]  ;;  %v2339_v17 = vld [vmem:[%s2262_s20 + $0x10] sm:$0xff]  ;;  %v1021_v19 = vld [vmem:[#allocation11 + $0x8] sm:$0xff]  ;;  %v697_v2 = vsub.s32 2, %v688_v25 }
  0xe3   : > { %1479 = vmatprep.subr.bf16.mxu0 %v1928_v0  ;;  %v1497_v12 = vpack.c.bf16 %v881_v7, %v879_v6  ;;  %v2325_v15 = vld [vmem:[%s2262_s20] sm:$0xff]  ;;  %v2333_v16 = vld [vmem:[%s2262_s20 + $0x8] sm:$0xff]  ;;  %v1020_v18 = vld [vmem:[#allocation11] sm:$0xff] }
  0xe4   : > { %1470 = vmatpush1.bf16.msra.mxu1 %v1469_v37  ;;  %v1500_v20 = vpack.c.bf16 %v1021_v19, %v1020_v18  ;;  %v1022_v21 = vld [vmem:[#allocation11 + $0x10] sm:$0xff]  ;;  %v1023_v22 = vld [vmem:[#allocation11 + $0x18] sm:$0xff]  ;;  %v685_v28 = vld [vmem:[%s2485_s3] sm:$0x7] }
  0xe5   : > { %1401 = vmatmul.mubr.msk.f32.vlgmr.msra.gmra.mrb[2].mxu0 %vm441_vm1, %v425_v41  ;;  %1472 = vmatprep.subr.bf16.mxu1 %v1471_v38  ;;  %v1503_v23 = vpack.c.bf16 %v1023_v22, %v1022_v21  ;;  %v694_v30 = vrot.slane %v685_v28, %v693_v26 }
  0xe6   : > { %1481 = vmatpush3.bf16.msra.mxu0 %v1480_v42  ;;  %1419 = vmatprep.mubr.msk.f32.mxu0 %vm1929_vm0, %v1930_v1 }
  0xe7   : > { %1482 = vmatprep.subr.bf16.mxu0 %v1928_v0 }
  0xe8   : > { %1474 = vmatpush1.bf16.msra.mxu1 %v1473_v47 }
  0xe9   : > { %1476 = vmatprep.subr.bf16.mxu1 %v1475_v48 }
  0xea   : > { %1484 = vmatpush3.bf16.msra.mxu0 %v1483_v51 }
  0xeb   : > { %1485 = vmatprep.subr.bf16.mxu0 %v1928_v0 }
  0xec   : > { %1478 = vmatpush1.bf16.msra.mxu1 %v1477_v54  ;;  %v689_v54 = vsub.s32 0, %v688_v25 }
  0xed   : > { %1492 = vmatprep.subr.bf16.mxu1 %v1491_v61 }
  0xee   : > { %1487 = vmatpush3.bf16.msra.mxu0 %v1486_v55  ;;  %v690_v55 = vrot.slane %v685_v28, %v689_v54 }
  0xef   : > { %1488 = vmatprep.subr.bf16.mxu0 %v1928_v0 }
  0xf2   : > { %1490 = vmatpush3.bf16.msra.mxu0 %v1489_v58 }
  0xf3   : > { %1499 = vmatprep.subr.bf16.mxu0 %v1928_v0 }
 0x1b0   : > { %v511_v8 = vpop.f32.mrb[0].mxu0 }
 0x1b1   : > { %v1380_v9 = vpop.f32.mrb[1].mxu0  ;;  %1310 = vmatmul.mubr.msk.f32.vlgmr.msra.gmra.mrb[2].mxu1 %vm702_vm2, %v511_v8  ;;  %1420 = vmatmul.mubr.msk.f32.vlgmr.msra.gmra.mrb[4].mxu0 %vm702_vm2, %v511_v8  ;;  %v584_v10 = vpop.f32.mrb[0].mxu1 }
 0x1b2   : > { %1494 = vmatpush1.bf16.msra.mxu1 %v1493_v4  ;;  %v1391_v11 = vpop.f32.mrb[1].mxu1  ;;  %782 = vmatprep.mubr.f32.mxu1 %v1930_v1 }
 0x1b3   : > { %1422 = vmatprep.mubr.msk.f32.mxu0 %vm1929_vm0, %v1930_v1  ;;  %1496 = vmatprep.subr.bf16.mxu1 %v1495_v5  ;;  %v698_v5 = vrot.slane %v685_v28, %v697_v2 }
 0x1b4   : > { %1501 = vmatpush3.bf16.msra.mxu0 %v1500_v20 }
 0x1b5   : > { %1311 = vmatmul.mubr.msk.f32.gmra.mrb[4].mxu1 %vm702_vm2, %v584_v10  ;;  %1423 = vmatmul.mubr.msk.f32.gmra.mrb[6].mxu0 %vm702_vm2, %v584_v10 }
 0x1b6   : > { %1498 = vmatpush1.bf16.msra.mxu1 %v1497_v12  ;;  %788 = vmatprep.mubr.f32.mxu1 %v1930_v1 }
 0x1b7   : > { %1425 = vmatprep.mubr.msk.f32.mxu0 %vm1929_vm0, %v1930_v1  ;;  %1505 = vmatprep.subr.bf16.mxu1 %v1928_v0 }
 0x1b8   : > { %v657_v13 = vpop.f32.mrb[2].mxu0  ;;  %1502 = vmatprep.subr.bf16.mxu0 %v1928_v0 }
 0x1b9   : > { %v1402_v14 = vpop.f32.mrb[3].mxu0  ;;  %1312 = vmatmul.mubr.msk.f32.gmra.mrb[6].mxu1 %vm702_vm2, %v657_v13  ;;  %1426 = vmatmul.mubr.msk.f32.gmra.mrb[8].mxu0 %vm702_vm2, %v657_v13 }
 0x1ba   : > { %956 = vmatprep.mubr.f32.mxu1 %v1930_v1  ;;  %1436 = vmatprep.mubr.msk.f32.mxu0 %vm1929_vm0, %v1930_v1 }
 0x1bb   : > { %1504 = vmatpush3.bf16.msra.mxu0 %v1503_v23 }
 0x1bd   : > { %1316 = vmatmul.mubr.msk.f32.vlgmr.msra.gmra.mrb[2].mxu1 %vm441_vm1, %v2325_v15 }
 0x1be   : > { %962 = vmatprep.mubr.f32.mxu1 %v1930_v1  ;;  %1507 = vmatpush3.bf16.msra.mxu1 %v1500_v20 }
 0x1bf   : > { %1506 = vmatprep.subr.bf16.mxu1 %v1928_v0 }
 0x1c1   : > { %1317 = vmatmul.mubr.msk.f32.gmra.mrb[4].mxu1 %vm441_vm1, %v2333_v16 }
 0x1c2   : > { %968 = vmatprep.mubr.f32.mxu1 %v1930_v1  ;;  %1508 = vmatpush3.bf16.msra.mxu1 %v1503_v23 }
 0x1c5   : > { %1318 = vmatmul.mubr.msk.f32.gmra.mrb[6].mxu1 %vm441_vm1, %v2339_v17 }
 0x1c6   : > { %1442 = vmatprep.mubr.msk.f32.mxu1 %vm1929_vm0, %v1930_v1 }
 0x28c   : > { %v2347_v27 = vpop.f32.mrb[8].mxu0 }
 0x28d   : > { %v1427_v29 = vpop.f32.mrb[9].mxu0  ;;  %v872_v14 = vadd.f32 %v2347_v27, %v698_v5 }
 0x290   : > { %v958_v31 = vpop.f32.mrb[2].mxu1 }
 0x291   : > { %v960_v32 = vpop.f32.mrb[3].mxu1  ;;  %v1509_v56 = vadd.f32 %v958_v31, %v690_v55 }
 0x292   : > { %v1510_v33 = vadd.f32 %v960_v32, %v694_v30 }
 0x293   : > { %v1319_v57 = vmul.f32 -1.442695, %v1509_v56 }
 0x294   : > { %v1322_v34 = vmul.f32 -1.442695, %v1510_v33  ;;  %v964_v35 = vpop.f32.mrb[4].mxu1 }
 0x295   : > { %v966_v0 = vpop.f32.mrb[5].mxu1  ;;  %v1511_v58 = vadd.f32 %v964_v35, %v690_v55 }
 0x296   : > { %1632 = vpow2.f32 %v1322_v34  ;;  %v1512_v36 = vadd.f32 %v966_v0, %v694_v30 }
 0x297   : > { %v1320_v59 = vmul.f32 -1.442695, %v1511_v58 }
 0x298   : > { %v1323_v37 = vmul.f32 -1.442695, %v1512_v36  ;;  %v970_v38 = vpop.f32.mrb[6].mxu1 }
 0x299   : > { %v972_v39 = vpop.f32.mrb[7].mxu1  ;;  %v1513_v60 = vadd.f32 %v970_v38, %v690_v55 }
 0x29a   : > { %1634 = vpow2.f32 %v1323_v37  ;;  %v1514_v40 = vadd.f32 %v972_v39, %v694_v30 }
 0x29b   : > { %v1321_v61 = vmul.f32 -1.442695, %v1513_v60 }
 0x29c   : > { %v1324_v41 = vmul.f32 -1.442695, %v1514_v40 }
 0x29e   : > { %1636 = vpow2.f32 %v1324_v41 }
 0x2a0   : > { %v1633_v42 = vpop.eup %1632 }
 0x2a1   : > { %v1008_v43 = vadd.f32 1.0, %v1633_v42 }
 0x2a3   : > { %1638 = vrcp.f32 %v1008_v43 }
 0x2a4   : > { %v1635_v44 = vpop.eup %1634 }
 0x2a5   : > { %v1009_v45 = vadd.f32 1.0, %v1635_v44 }
 0x2a7   : > { %1640 = vrcp.f32 %v1009_v45 }
 0x2a8   : > { %v1637_v46 = vpop.eup %1636 }
 0x2a9   : > { %v1010_v47 = vadd.f32 1.0, %v1637_v46 }
 0x2ab   : > { %1642 = vrcp.f32 %v1010_v47 }
 0x2ac   : > { %1644 = vpow2.f32 %v1319_v57 }
 0x2ad   : > { %v1639_v48 = vpop.eup %1638  ;;  %1646 = vpow2.f32 %v1320_v59 }
 0x2ae   : > { %v1017_v49 = vmul.f32 %v1639_v48, %v2325_v15  ;;  %1648 = vpow2.f32 %v1321_v61 }
 0x2b0   : > { %1437 = vmatmul.mubr.msk.f32.vlgmr.msra.gmra.mrb[4].mxu0 %vm441_vm1, %v1017_v49 }
 0x2b1   : > { %v1641_v50 = vpop.eup %1640  ;;  %1439 = vmatprep.mubr.msk.f32.mxu0 %vm1929_vm0, %v1930_v1 }
 0x2b2   : > { %v1018_v51 = vmul.f32 %v1641_v50, %v2333_v16 }
 0x2b4   : > { %1440 = vmatmul.mubr.msk.f32.gmra.mrb[6].mxu0 %vm441_vm1, %v1018_v51 }
 0x2b5   : > { %v1643_v52 = vpop.eup %1642 }
 0x2b6   : > { %v1019_v53 = vmul.f32 %v1643_v52, %v2339_v17  ;;  %v1645_v1 = vpop.eup %1644 }
 0x2b7   : > { %v987_v62 = vadd.f32 1.0, %v1645_v1  ;;  %v1647_v63 = vpop.eup %1646 }
 0x2b8   : > { %1443 = vmatmul.mubr.msk.f32.vlgmr.msra.gmra.mrb[8].mxu1 %vm441_vm1, %v1019_v53  ;;  %v988_v3 = vadd.f32 1.0, %v1647_v63  ;;  %v1649_v4 = vpop.eup %1648 }
 0x2b9   : > { %1650 = vrcp.f32 %v987_v62  ;;  %v989_v7 = vadd.f32 1.0, %v1649_v4 }
 0x2ba   : > { %1652 = vrcp.f32 %v988_v3 }
 0x2c3   : > { %v1651_v13 = vpop.eup %1650 }
 0x2c4   : > { %v1119_v21 = vsub.f32 1.0, %v1651_v13  ;;  %v1653_v22 = vpop.eup %1652 }
 0x2c5   : > { %v1120_v24 = vsub.f32 1.0, %v1653_v22 }
 0x2c6   : > { %v1122_v25 = vmul.f32 %v1119_v21, %v2325_v15 }
 0x2c7   : > { %v1123_v27 = vmul.f32 %v1120_v24, %v2333_v16 }
 0x383   : > { %v1099_v6 = vpop.f32.mrb[4].mxu0 }
 0x384   : > { %v1515_v8 = vadd.f32 %v1099_v6, %v698_v5  ;;  %v1438_v9 = vpop.f32.mrb[5].mxu0 }
 0x386   : > { %1654 = vtanh.f32 %v1515_v8 }
 0x387   : > { %v1104_v10 = vpop.f32.mrb[6].mxu0  ;;  %1656 = vrcp.f32 %v989_v7 }
 0x388   : > { %v1516_v11 = vadd.f32 %v1104_v10, %v698_v5  ;;  %v1441_v12 = vpop.f32.mrb[7].mxu0 }
 0x38a   : > { %1658 = vtanh.f32 %v1516_v11 }
 0x38b   : > { %v1109_v18 = vpop.f32.mrb[8].mxu1 }
 0x38c   : > { %v1115_v19 = vadd.f32 %v1109_v18, %v872_v14  ;;  %v1444_v20 = vpop.f32.mrb[9].mxu1 }
 0x38e   : > { %1660 = vtanh.f32 %v1115_v19 }
 0x390   : > { %v1655_v23 = vpop.eup %1654 }
 0x391   : > { %v1125_v26 = vmul.f32 %v1655_v23, %v1651_v13  ;;  %v1657_v28 = vpop.eup %1656 }
 0x392   : > { %v1121_v31 = vsub.f32 1.0, %v1657_v28 }
 0x393   : > { %v1128_v29 = vadd.f32 %v1125_v26, %v1122_v25 }
 0x394   : > { %v1659_v30 = vpop.eup %1658  ;;  %v1124_v35 = vmul.f32 %v1121_v31, %v2339_v17 }
 0x395   : > { %v1126_v32 = vmul.f32 %v1659_v30, %v1653_v22  ;;  %1131 = vst.msk [vmem:[%s418_s30] sm:$0xff] %vm441_vm1, %v1128_v29 }
 0x397   : > { %v1129_v33 = vadd.f32 %v1126_v32, %v1123_v27 }
 0x398   : > { %v1661_v34 = vpop.eup %1660 }
 0x399   : > { %v1127_v15 = vmul.f32 %v1661_v34, %v1657_v28  ;;  %1132 = vst.msk [vmem:[%s418_s30 + $0x8] sm:$0xff] %vm441_vm1, %v1129_v33 }
 0x39b   : > { %v1130_v16 = vadd.f32 %v1127_v15, %v1124_v35 }
 0x39d   : > { %1133 = vst.msk [vmem:[%s418_s30 + $0x10] sm:$0xff] %vm441_vm1, %v1130_v16 }
 0x39e   : > { %1849 = shalt.err (!%p1846_p0)
}
 0x39f   : > { %s1850_s22 = scalar_lea.hbm %s2371_s16, 384  ;;  %s1854_s15 = scalar_lea.hbm %s2487_s29, 768 }
 0x3a0   : > { %p1851_p8 = scmp.ne.s32.totalorder %s2371_s16, %s1850_s22  ;;  %p1855_p5 = scmp.lt.u32.totalorder %s2371_s16, %s2487_s29 }
 0x3a1   : > { %p1856_p12 = scmp.lt.u32.totalorder %s1854_s15, %s1850_s22  ;;  %p1858_p7 = scmp.lt.u32.totalorder %s1850_s22, %s2371_s16 }
 0x3a2   : > { %p1852_p1 = pnand %p1851_p8, %p2488_p11 }
 0x3a3   : > { %p1857_p3 = por %p1856_p12, %p1855_p5 }
 0x3a4   : > { %p1853_p6 = pneg %p1852_p1 }
 0x3a5   : > { %p1859_p2 = por %p1858_p7, %p1857_p3 }
 0x3a7   : > { %p1860_p13 = pnand %p1859_p2, %p1853_p6 }
 0x3a9   : > { %1863 = shalt.err (!%p1860_p13)
}
 0x3aa   : > { %s1932_s24 = smov 128   ;;  %s1933_s20 = smov 8  }
 0x3ab   : > { %1552 = dma.vmem_to_hbm [thread:$0]  (%p2488_p11), %s2373_s10, 384, %s2371_s16, %s1135_s28, %s1932_s24, %s1932_s24, %s1933_s20  }
 0x3ac PF: > { %s2489_s12 = sld [smem:[#allocation19_spill]]  ;;  %s2490_s18 = sld [smem:[#allocation24_spill]] }
 0x3ad   : > { %p2492_p10 = scmp.ge.s32.totalorder %s1914_s27, 2 }
 0x3b2   : > { %s1163_s3 = sand.u32 1, %s2489_s12   ;;  %p2491_p9 = scmp.ne.s32.totalorder %s2490_s18, 0 }
 0x3b3   : > { %s1164_s30 = scalar_lea.sflag [#allocation4], %s1163_s3 }
 0x3b4   : > { %p1575_p4 = pnand %p2492_p10, %p2491_p9 }
 0x3b6   : > { %1897 = dma.done.wait (!%p1575_p4), %s1164_s30, 384  }
 0x3b7   : > { %1899 = vsyncadd (!%p1575_p4), %s1164_s30, 4294966912  ;;  %s2493_s27 = sld [smem:[#allocation21_spill]]  ;;  %s2494_s14 = sld [smem:[#allocation20_spill]] }
 0x3b8   : > { %s2495_s26 = sld [smem:[#allocation22_spill]]  ;;  %s2496_s24 = smov %s1906_s25 }
 0x3bd   : > { %p25_p0 = scmp.ge.s32.totalorder %s2493_s27, 4   ;;  %s2497_s25 = smov %s2494_s14 }
 0x3bf   :  { %27 = sbr.rel (!%p25_p0) target bundleno = 14 (0xe), region = 129 }
 0x3c6   :  { %1169 = vsyncpa [#allocation3], 1 }
 0x3c7   :  { %1171 = vsyncpa [#allocation3 + $0x1], 1 }
 0x3c8   :  { %1172 = vsyncpa [#allocation6], 1 }
 0x3c9   :  { %1174 = vsyncpa [#allocation6 + $0x1], 1 }
 0x3ca   :  { %1175 = vsyncpa [#allocation9], 1 }
 0x3cb   :  { %1176 = vsyncpa [#allocation12], 1 }
 0x3cc   :  { %1177 = vsyncpa [#allocation4], 1 }
 0x3cd   :  { %1179 = vsyncpa [#allocation4 + $0x1], 1 }

</bundles_post_ra>
